<compile_context>
chip_gen: v5e
topology: v5e:2x2
jax: 0.10.0
libtpu: 0.0.40
codegen_flags: <defaults>
</compile_context>

<pallas_src>
import functools

import jax
import jax.numpy as jnp
import numpy as np
from jax.experimental import pallas as pl
from jax.experimental.pallas import tpu as pltpu


def _prop_ln_kernel(x_ref, scale_ref, shift_ref, o_ref, *, eps, inv_d):
    """LayerNorm over the last dim of a (TM, D) tile with fused affine."""
    x = x_ref[...].astype(jnp.float32)                       # (TM, D)
    s1 = jnp.sum(x, axis=-1, keepdims=True)                  # (TM, 1)
    s2 = jnp.sum(x * x, axis=-1, keepdims=True)              # (TM, 1)
    mean = s1 * inv_d
    var = jnp.maximum(s2 * inv_d - mean * mean, 0.0)         # biased var (torch)
    rstd = jax.lax.rsqrt(var + eps)                          # EUP rsqrt
    y = (x - mean) * rstd * scale_ref[...] + shift_ref[...]
    o_ref[...] = y.astype(o_ref.dtype)


def _prop_ln_kernel_grouped(x_ref, scale_ref, shift_ref, o_ref, *, eps, g, d):
    """Lane-dense variant: G = 128//D rows packed per 128-lane slab.

    x_ref/o_ref : (TM, G*D); scale_ref/shift_ref : (1, G*D) (params tiled G x).
    Per-segment reductions and the broadcast back use small block-diagonal MXU
    matmuls, so there is no in-kernel reshape/transpose and stores stay
    unmasked full-lane vst.
    """
    w = g * d
    x = x_ref[...].astype(jnp.float32)                       # (TM, G*D)

    # Block-diagonal segment indicators from 2-D iotas (no integer division).
    e_i = jax.lax.broadcasted_iota(jnp.int32, (w, g), 0)     # element index
    g_i = jax.lax.broadcasted_iota(jnp.int32, (w, g), 1)     # segment index
    ind = ((e_i >= g_i * d) & (e_i < (g_i + 1) * d)).astype(jnp.float32)    # (G*D, G)
    g_j = jax.lax.broadcasted_iota(jnp.int32, (g, w), 0)
    e_j = jax.lax.broadcasted_iota(jnp.int32, (g, w), 1)
    ind_t = ((e_j >= g_j * d) & (e_j < (g_j + 1) * d)).astype(jnp.float32)  # (G, G*D)

    inv_d = jnp.float32(1.0 / d)
    mean = jnp.dot(x, ind, preferred_element_type=jnp.float32) * inv_d      # (TM, G)
    ex2 = jnp.dot(x * x, ind, preferred_element_type=jnp.float32) * inv_d   # (TM, G)
    var = jnp.maximum(ex2 - mean * mean, 0.0)
    rstd = jax.lax.rsqrt(var + eps)                                         # (TM, G)
    mean_f = jnp.dot(mean, ind_t, preferred_element_type=jnp.float32)       # (TM, G*D)
    rstd_f = jnp.dot(rstd, ind_t, preferred_element_type=jnp.float32)       # (TM, G*D)

    y = (x - mean_f) * rstd_f * scale_ref[...] + shift_ref[...]
    o_ref[...] = y.astype(o_ref.dtype)


def _vmem_capacity_bytes():
    try:
        info = pltpu.get_tpu_info()
        cap = getattr(info, "vmem_capacity_bytes", None)
        if cap:
            return int(cap)
    except Exception:
        pass
    return 64 * 1024 * 1024   # conservative fallback: v7x per-TensorCore VMEM


def _choose_tile(n_rows, width, itemsize, tm=None):
    """Pick the row-tile size from a per-generation VMEM budget."""
    cap = _vmem_capacity_bytes()
    vmem_limit = int(min(cap * 3 // 4, 96 * 1024 * 1024))     # scoped VMEM to request
    if tm is None:
        budget = vmem_limit * 2 // 3                          # leave compiler headroom
        # double-buffered in+out in x dtype + ~5 f32-wide temporaries per row
        bytes_per_row = width * (4 * itemsize + 20)
        tm = budget // max(bytes_per_row, 1)
        tm = max(8, min(1024, (tm // 8) * 8))
    if n_rows <= tm:
        tm = n_rows                 # single block == full array rows (always legal)
    else:
        tm = max(8, (tm // 8) * 8)  # multiple of 8; ragged tail masked by Pallas
    return tm, vmem_limit


def propulsion_layer_norm(x, gamma, beta, propulsion, *, degree=1, eps=1e-5,
                          tm=None):
    """x: (..., D); gamma/beta/propulsion: (D,). Returns LayerNorm(x) * push."""
    orig_shape = x.shape
    d = orig_shape[-1]
    x2 = x.reshape(-1, d)
    n = x2.shape[0]
    itemsize = jnp.dtype(x.dtype).itemsize

    # One-time (D,) parameter fusion, hoisted out of the grid loop:
    #   LayerNorm(x) * push == xhat * (gamma*push) + (beta*push)
    push = propulsion.astype(jnp.float32) ** degree
    scale = (gamma.astype(jnp.float32) * push).reshape(1, d)
    shift = (beta.astype(jnp.float32) * push).reshape(1, d)

    # Lane-dense grouping for narrow feature dims (D < 128).
    g = 1
    if d < 128 and 128 % d == 0 and n % (128 // d) == 0:
        g = 128 // d
    if g > 1:
        x_in = x2.reshape(n // g, g * d)          # G rows per 128-lane slab (free reshape)
        scale_in = jnp.tile(scale, (1, g))
        shift_in = jnp.tile(shift, (1, g))
        kernel = functools.partial(_prop_ln_kernel_grouped, eps=eps, g=g, d=d)
    else:
        x_in, scale_in, shift_in = x2, scale, shift
        kernel = functools.partial(_prop_ln_kernel, eps=eps, inv_d=1.0 / d)

    n_rows, width = x_in.shape
    blk, vmem_limit = _choose_tile(n_rows, width, itemsize, tm)

    cost = pl.CostEstimate(
        flops=10 * n * d,
        transcendentals=n,                         # one rsqrt per row
        bytes_accessed=2 * n * d * itemsize + 2 * 4 * width,
    )

    out = pl.pallas_call(
        kernel,
        out_shape=jax.ShapeDtypeStruct((n_rows, width), x.dtype),
        grid=(pl.cdiv(n_rows, blk),),              # ragged tail masked, no pad/slice
        in_specs=[
            pl.BlockSpec((blk, width), lambda i: (i, 0)),   # x tile (pipelined)
            pl.BlockSpec((1, width), lambda i: (0, 0)),     # fused scale (resident)
            pl.BlockSpec((1, width), lambda i: (0, 0)),     # fused shift (resident)
        ],
        out_specs=pl.BlockSpec((blk, width), lambda i: (i, 0)),
        compiler_params=pltpu.CompilerParams(
            dimension_semantics=("parallel",),     # independent row tiles (megacore)
            vmem_limit_bytes=vmem_limit,
        ),
        cost_estimate=cost,
    )(x_in, scale_in, shift_in)

    return out.reshape(orig_shape)


def _reference(x, gamma, beta, propulsion, degree, eps):
    mean = x.mean(-1, keepdims=True)
    var = ((x - mean) ** 2).mean(-1, keepdims=True)
    ln = (x - mean) / jnp.sqrt(var + eps) * gamma + beta
    return ln * (propulsion ** degree)


if __name__ == "__main__":
    key = jax.random.PRNGKey(0)
    k_x, k_g, k_b, k_p, k_x2, k_x3 = jax.random.split(key, 6)

    B, S, D = 2, 8, 32
    DEGREE = 2
    EPS = 1e-5

    gamma = 1.0 + 0.1 * jax.random.normal(k_g, (D,), dtype=jnp.float32)
    beta = 0.1 * jax.random.normal(k_b, (D,), dtype=jnp.float32)
    propulsion = 1.0 + 0.05 * jax.random.uniform(k_p, (D,), dtype=jnp.float32)

    # 1) Main case: lane-dense grouped path (4 rows of D=32 per 128-lane slab).
    x = jax.random.normal(k_x, (B, S, D), dtype=jnp.float32)
    out = jax.block_until_ready(
        propulsion_layer_norm(x, gamma, beta, propulsion, degree=DEGREE, eps=EPS))
    ref = _reference(x, gamma, beta, propulsion, DEGREE, EPS)
    np.testing.assert_allclose(np.asarray(out), np.asarray(ref),
                               rtol=1e-4, atol=1e-4)

    # 2) Row count not a multiple of the group/tile: standard path plus a
    #    ragged (masked) last block, with a forced small tile.
    x2 = jax.random.normal(k_x2, (13, D), dtype=jnp.float32)
    out2 = jax.block_until_ready(
        propulsion_layer_norm(x2, gamma, beta, propulsion,
                              degree=DEGREE, eps=EPS, tm=8))
    ref2 = _reference(x2, gamma, beta, propulsion, DEGREE, EPS)
    np.testing.assert_allclose(np.asarray(out2), np.asarray(ref2),
                               rtol=1e-4, atol=1e-4)

    # 3) Grouped path with a ragged (masked) last block.
    x3 = jax.random.normal(k_x3, (40, D), dtype=jnp.float32)
    out3 = jax.block_until_ready(
        propulsion_layer_norm(x3, gamma, beta, propulsion,
                              degree=DEGREE, eps=EPS, tm=8))
    ref3 = _reference(x3, gamma, beta, propulsion, DEGREE, EPS)
    np.testing.assert_allclose(np.asarray(out3), np.asarray(ref3),
                               rtol=1e-4, atol=1e-4)

    print("KERNEL_OK")
</pallas_src>

<mosaic_0001>
module attributes {stable_mosaic.version = 11 : i64} {
  func.func @_prop_ln_kernel_grouped(%arg0: i32, %arg1: memref<4x128xf32, #tpu.memory_space<vmem>>, %arg2: memref<1x128xf32, #tpu.memory_space<vmem>>, %arg3: memref<1x128xf32, #tpu.memory_space<vmem>>, %arg4: memref<4x128xf32, #tpu.memory_space<vmem>>) attributes {dimension_semantics = [#tpu.dimension_semantics<parallel>], iteration_bounds = array<i64: 1>, scalar_prefetch = 0 : i64, scratch_operands = 0 : i64, tpu.core_type = #tpu.core_type<tc>, window_params = [{transform_indices = @transform_0, window_bounds = array<i64: 4, 128>}, {pipeline_mode = #tpu.pipeline_mode<synchronous>, transform_indices = @transform_1, window_bounds = array<i64: 1, 128>}, {pipeline_mode = #tpu.pipeline_mode<synchronous>, transform_indices = @transform_2, window_bounds = array<i64: 1, 128>}, {transform_indices = @transform_3, window_bounds = array<i64: 4, 128>}]} {
    %c0 = arith.constant 0 : index
    %c0_0 = arith.constant 0 : index
    %0 = vector.load %arg1[%c0, %c0_0] : memref<4x128xf32, #tpu.memory_space<vmem>>, vector<4x128xf32>
    %1 = tpu.iota {dimensions = array<i32: 0>} : vector<128x4xi32>
    %2 = tpu.iota {dimensions = array<i32: 1>} : vector<128x4xi32>
    %c32_i32 = arith.constant 32 : i32
    %3 = vector.broadcast %c32_i32 : i32 to vector<128x4xi32>
    %4 = arith.muli %2, %3 : vector<128x4xi32>
    %5 = arith.cmpi sge, %1, %4 : vector<128x4xi32>
    %c1_i32 = arith.constant 1 : i32
    %6 = vector.broadcast %c1_i32 : i32 to vector<128x4xi32>
    %7 = arith.addi %2, %6 : vector<128x4xi32>
    %c32_i32_1 = arith.constant 32 : i32
    %8 = vector.broadcast %c32_i32_1 : i32 to vector<128x4xi32>
    %9 = arith.muli %7, %8 : vector<128x4xi32>
    %10 = arith.cmpi slt, %1, %9 : vector<128x4xi32>
    %11 = arith.andi %5, %10 : vector<128x4xi1>
    %12 = arith.extui %11 : vector<128x4xi1> to vector<128x4xi32>
    %13 = arith.sitofp %12 : vector<128x4xi32> to vector<128x4xf32>
    %14 = tpu.iota {dimensions = array<i32: 0>} : vector<4x128xi32>
    %15 = tpu.iota {dimensions = array<i32: 1>} : vector<4x128xi32>
    %c32_i32_2 = arith.constant 32 : i32
    %16 = vector.broadcast %c32_i32_2 : i32 to vector<4x128xi32>
    %17 = arith.muli %14, %16 : vector<4x128xi32>
    %18 = arith.cmpi sge, %15, %17 : vector<4x128xi32>
    %c1_i32_3 = arith.constant 1 : i32
    %19 = vector.broadcast %c1_i32_3 : i32 to vector<4x128xi32>
    %20 = arith.addi %14, %19 : vector<4x128xi32>
    %c32_i32_4 = arith.constant 32 : i32
    %21 = vector.broadcast %c32_i32_4 : i32 to vector<4x128xi32>
    %22 = arith.muli %20, %21 : vector<4x128xi32>
    %23 = arith.cmpi slt, %15, %22 : vector<4x128xi32>
    %24 = arith.andi %18, %23 : vector<4x128xi1>
    %25 = arith.extui %24 : vector<4x128xi1> to vector<4x128xi32>
    %26 = arith.sitofp %25 : vector<4x128xi32> to vector<4x128xf32>
    %cst = arith.constant dense<0.000000e+00> : vector<4x4xf32>
    %27 = tpu.matmul %0, %13, %cst {dimension_numbers = #tpu.dot_dimension_numbers<[1], [0], [0], [1], [0, 0, 1, 1], [], []>} : vector<4x128xf32>, vector<128x4xf32>, vector<4x4xf32> -> vector<4x4xf32>
    %cst_5 = arith.constant 3.125000e-02 : f32
    %28 = vector.broadcast %cst_5 : f32 to vector<4x4xf32>
    %29 = arith.mulf %27, %28 : vector<4x4xf32>
    %30 = arith.mulf %0, %0 : vector<4x128xf32>
    %cst_6 = arith.constant dense<0.000000e+00> : vector<4x4xf32>
    %31 = tpu.matmul %30, %13, %cst_6 {dimension_numbers = #tpu.dot_dimension_numbers<[1], [0], [0], [1], [0, 0, 1, 1], [], []>} : vector<4x128xf32>, vector<128x4xf32>, vector<4x4xf32> -> vector<4x4xf32>
    %cst_7 = arith.constant 3.125000e-02 : f32
    %32 = vector.broadcast %cst_7 : f32 to vector<4x4xf32>
    %33 = arith.mulf %31, %32 : vector<4x4xf32>
    %34 = arith.mulf %29, %29 : vector<4x4xf32>
    %35 = arith.subf %33, %34 : vector<4x4xf32>
    %cst_8 = arith.constant 0.000000e+00 : f32
    %36 = vector.broadcast %cst_8 : f32 to vector<4x4xf32>
    %37 = arith.maximumf %35, %36 : vector<4x4xf32>
    %cst_9 = arith.constant 9.99999974E-6 : f32
    %38 = vector.broadcast %cst_9 : f32 to vector<4x4xf32>
    %39 = arith.addf %37, %38 : vector<4x4xf32>
    %40 = math.rsqrt %39 : vector<4x4xf32>
    %cst_10 = arith.constant dense<0.000000e+00> : vector<4x128xf32>
    %41 = tpu.matmul %29, %26, %cst_10 {dimension_numbers = #tpu.dot_dimension_numbers<[1], [0], [0], [1], [0, 0, 1, 1], [], []>} : vector<4x4xf32>, vector<4x128xf32>, vector<4x128xf32> -> vector<4x128xf32>
    %cst_11 = arith.constant dense<0.000000e+00> : vector<4x128xf32>
    %42 = tpu.matmul %40, %26, %cst_11 {dimension_numbers = #tpu.dot_dimension_numbers<[1], [0], [0], [1], [0, 0, 1, 1], [], []>} : vector<4x4xf32>, vector<4x128xf32>, vector<4x128xf32> -> vector<4x128xf32>
    %43 = arith.subf %0, %41 : vector<4x128xf32>
    %44 = arith.mulf %43, %42 : vector<4x128xf32>
    %c0_12 = arith.constant 0 : index
    %c0_13 = arith.constant 0 : index
    %45 = vector.load %arg2[%c0_12, %c0_13] : memref<1x128xf32, #tpu.memory_space<vmem>>, vector<1x128xf32>
    %46 = vector.broadcast %45 : vector<1x128xf32> to vector<4x128xf32>
    %47 = arith.mulf %44, %46 : vector<4x128xf32>
    %c0_14 = arith.constant 0 : index
    %c0_15 = arith.constant 0 : index
    %48 = vector.load %arg3[%c0_14, %c0_15] : memref<1x128xf32, #tpu.memory_space<vmem>>, vector<1x128xf32>
    %49 = vector.broadcast %48 : vector<1x128xf32> to vector<4x128xf32>
    %50 = arith.addf %47, %49 : vector<4x128xf32>
    %c0_16 = arith.constant 0 : index
    %c0_17 = arith.constant 0 : index
    %51 = vector.load %arg4[%c0_16, %c0_17] : memref<4x128xf32, #tpu.memory_space<vmem>>, vector<4x128xf32>
    tpu.vector_store %arg4[%c0_16, %c0_17], %50 {strides = array<i32>} : memref<4x128xf32, #tpu.memory_space<vmem>>, vector<4x128xf32>,
    return
  }
  func.func @transform_0(%arg0: i32) -> (i32, i32) {
    %c0_i32 = arith.constant 0 : i32
    %c0_i32_0 = arith.constant 0 : i32
    return %arg0, %c0_i32 : i32, i32
  }
  func.func @transform_1(%arg0: i32) -> (i32, i32) {
    %c0_i32 = arith.constant 0 : i32
    %c0_i32_0 = arith.constant 0 : i32
    %c0_i32_1 = arith.constant 0 : i32
    return %c0_i32, %c0_i32_0 : i32, i32
  }
  func.func @transform_2(%arg0: i32) -> (i32, i32) {
    %c0_i32 = arith.constant 0 : i32
    %c0_i32_0 = arith.constant 0 : i32
    %c0_i32_1 = arith.constant 0 : i32
    return %c0_i32, %c0_i32_0 : i32, i32
  }
  func.func @transform_3(%arg0: i32) -> (i32, i32) {
    %c0_i32 = arith.constant 0 : i32
    %c0_i32_0 = arith.constant 0 : i32
    return %arg0, %c0_i32 : i32, i32
  }
}

</mosaic_0001>

<bundles_post_ra>
// kernel: tpu_custom_call.1
= control target key start
LH: loop header
LB: loop body
LE: loop exit
PB: predicated region body
PF: predicated region fallthrough
CT: control target
= control target key end

     0   :  { %8 = vsyncpa [#allocation3], 0  ;;  %s567_s0 = inlined_call_operand.hbm [shape: f32[4,128], index: 0, kind: input, shape index: {}]   ;;  %s568_s1 = inlined_call_operand.hbm [shape: f32[1,128], index: 1, kind: input, shape index: {}]   ;;  %s569_s2 = inlined_call_operand.vmem [shape: f32[1,128], index: 2, kind: input, shape index: {}]   ;;  %s570_s3 = inlined_call_operand.hbm [shape: f32[4,128], index: 3, kind: output, shape index: {}]  }
   0x1   :  { %9 = vsyncpa [#allocation6], 0 }
   0x2   :  { %10 = vsyncpa [#allocation4], 0  ;;  %s16_s14 = sshll.u32 %s567_s0, 4  ;;  %s433_s15 = smov [#allocation2]   ;;  %s17_s14 = int_to_ptr.hbm [resolvable:$true] %s16_s14 }
   0x3   :  { %s18_s16 = sshll.u32 %s433_s15, 4  ;;  %s27_s19 = sshll.u32 %s568_s1, 4  ;;  %s19_s16 = int_to_ptr.vmem [resolvable:$true] %s18_s16  ;;  %s28_s19 = int_to_ptr.hbm [resolvable:$true] %s27_s19 }
   0x4   :  { %21 = dma.hbm_to_vmem [thread:$0]  %s17_s14, 64, %s19_s16, [#allocation3]  }
   0x5   :  { %s434_s20 = smov [#allocation5]  }
   0x6   :  { %s29_s21 = sshll.u32 %s434_s20, 4  ;;  %s30_s21 = int_to_ptr.vmem [resolvable:$true] %s29_s21 }
   0x7   :  { %32 = dma.hbm_to_vmem [thread:$0]  %s28_s19, 16, %s30_s21, [#allocation6]  }
   0x8   :  { %427 = dma.done.wait [#allocation3], 64  }
   0x9   :  { %428 = vsyncadd [#allocation3], 4294967232  ;;  %v44_v0 = vlaneseq }
   0xa   :  { %429 = dma.done.wait [#allocation6], 16  }
   0xb   :  { %430 = vsyncadd [#allocation6], 4294967280  ;;  %v464_v1 = vshrl.u32 %v44_v0, 7  ;;  %v466_v2 = vand.u32 127, %v44_v0  ;;  %v435_v11 = vmov 1.0   ;;  %v436_v27 = vmov 0.0  }
   0xc   :  { %v43_v22 = vld [vmem:[#allocation2] sm:$0xf]  ;;  %v351_v46 = vld [vmem:[#allocation5] ss:$0 sm:$0xff]  ;;  %s437_s22 = smov [#allocation7]   ;;  %s282_s26 = sshll.u32 %s570_s3, 4  ;;  %s283_s26 = int_to_ptr.hbm [resolvable:$true] %s282_s26 }
   0xd   :  { %v60_v3 = vadd.s32 120, %v464_v1  ;;  %v470_v4 = vmul.u32 32, %v466_v2  ;;  %v80_v5 = vadd.s32 1, %v466_v2  ;;  %v59_v6 = vadd.s32 112, %v464_v1  ;;  %v352_v49 = vld [vmem:[%s569_s2] ss:$0 sm:$0xff] }
   0xe   :  { %v58_v7 = vadd.s32 104, %v464_v1  ;;  %v57_v9 = vadd.s32 96, %v464_v1  ;;  %v56_v10 = vadd.s32 88, %v464_v1  ;;  %v55_v12 = vadd.s32 80, %v464_v1  ;;  %s280_s23 = sshll.u32 %s437_s22, 4  ;;  %s281_s23 = int_to_ptr.vmem [resolvable:$true] %s280_s23 }
   0xf   :  { %vm79_vm0 = vcmp.ge.s32.totalorder %v60_v3, %v470_v4  ;;  %v476_v8 = vmul.u32 32, %v80_v5  ;;  %vm78_vm1 = vcmp.ge.s32.totalorder %v59_v6, %v470_v4  ;;  %v54_v13 = vadd.s32 72, %v464_v1 }
  0x10   :  { %vm77_vm4 = vcmp.ge.s32.totalorder %v58_v7, %v470_v4  ;;  %vm76_vm8 = vcmp.ge.s32.totalorder %v57_v9, %v470_v4  ;;  %vm75_vm11 = vcmp.ge.s32.totalorder %v56_v10, %v470_v4  ;;  %vm74_vm14 = vcmp.ge.s32.totalorder %v55_v12, %v470_v4 }
  0x11   :  { %vm97_vm2 = vcmp.lt.s32.totalorder %v60_v3, %v476_v8  ;;  %vm96_vm3 = vcmp.lt.s32.totalorder %v59_v6, %v476_v8  ;;  %vm95_vm5 = vcmp.lt.s32.totalorder %v58_v7, %v476_v8  ;;  %vm94_vm9 = vcmp.lt.s32.totalorder %v57_v9, %v476_v8 }
  0x12   :  { %vm113_vm6 = vmand %vm79_vm0, %vm97_vm2  ;;  %vm93_vm12 = vcmp.lt.s32.totalorder %v56_v10, %v476_v8  ;;  %vm92_vm15 = vcmp.lt.s32.totalorder %v55_v12, %v476_v8  ;;  %v53_v14 = vadd.s32 64, %v464_v1  ;;  %vm91_vm2 = vcmp.lt.s32.totalorder %v54_v13, %v476_v8 }
  0x13   :  { %310 = vmatpush.msk.msra.mxu0 %vm113_vm6, %v435_v11  ;;  %vm112_vm7 = vmand %vm78_vm1, %vm96_vm3  ;;  %326 = vmatpush.msk.msra.mxu1 %vm113_vm6, %v435_v11  ;;  %vm73_vm1 = vcmp.ge.s32.totalorder %v54_v13, %v470_v4  ;;  %v52_v15 = vadd.s32 56, %v464_v1  ;;  %v51_v16 = vadd.s32 48, %v464_v1  ;;  %v50_v17 = vadd.s32 40, %v464_v1 }
  0x14   :  { %vm111_vm10 = vmand %vm77_vm4, %vm95_vm5  ;;  %vm72_vm4 = vcmp.ge.s32.totalorder %v53_v14, %v470_v4  ;;  %vm90_vm5 = vcmp.lt.s32.totalorder %v53_v14, %v476_v8  ;;  %v49_v18 = vadd.s32 32, %v464_v1  ;;  %v48_v19 = vadd.s32 24, %v464_v1 }
  0x15   :  { %311 = vmatpush.msk.msra.mxu0 %vm112_vm7, %v435_v11  ;;  %327 = vmatpush.msk.msra.mxu1 %vm112_vm7, %v435_v11  ;;  %vm110_vm13 = vmand %vm76_vm8, %vm94_vm9  ;;  %vm71_vm7 = vcmp.ge.s32.totalorder %v52_v15, %v470_v4  ;;  %vm89_vm8 = vcmp.lt.s32.totalorder %v52_v15, %v476_v8  ;;  %v47_v20 = vadd.s32 16, %v464_v1  ;;  %v46_v21 = vadd.s32 8, %v464_v1 }
  0x16   :  { %vm109_vm0 = vmand %vm75_vm11, %vm93_vm12  ;;  %vm88_vm11 = vcmp.lt.s32.totalorder %v51_v16, %v476_v8  ;;  %v175_v23 = vmul.f32 %v43_v22, %v43_v22  ;;  %v148_v24 = vadd.s32 1, %v464_v1  ;;  %v146_v25 = vmul.u32 32, %v464_v1 }
  0x17   :  { %312 = vmatpush.msk.msra.mxu0 %vm111_vm10, %v435_v11  ;;  %328 = vmatpush.msk.msra.mxu1 %vm111_vm10, %v435_v11  ;;  %vm108_vm3 = vmand %vm74_vm14, %vm92_vm15  ;;  %vm70_vm10 = vcmp.ge.s32.totalorder %v51_v16, %v470_v4  ;;  %vm87_vm14 = vcmp.lt.s32.totalorder %v50_v17, %v476_v8 }
  0x18   :  { %vm107_vm6 = vmand %vm73_vm1, %vm91_vm2  ;;  %vm86_vm1 = vcmp.lt.s32.totalorder %v49_v18, %v476_v8  ;;  %v149_v26 = vmul.u32 32, %v148_v24 }
  0x19   :  { %313 = vmatpush.msk.msra.mxu0 %vm110_vm13, %v435_v11  ;;  %329 = vmatpush.msk.msra.mxu1 %vm110_vm13, %v435_v11  ;;  %vm106_vm9 = vmand %vm72_vm4, %vm90_vm5  ;;  %vm69_vm13 = vcmp.ge.s32.totalorder %v50_v17, %v470_v4  ;;  %vm85_vm4 = vcmp.lt.s32.totalorder %v48_v19, %v476_v8 }
  0x1a   :  { %vm105_vm12 = vmand %vm71_vm7, %vm89_vm8  ;;  %vm84_vm7 = vcmp.lt.s32.totalorder %v47_v20, %v476_v8 }
  0x1b   :  { %314 = vmatpush.msk.msra.mxu0 %vm109_vm0, %v435_v11  ;;  %330 = vmatpush.msk.msra.mxu1 %vm109_vm0, %v435_v11  ;;  %vm104_vm15 = vmand %vm70_vm10, %vm88_vm11  ;;  %vm68_vm0 = vcmp.ge.s32.totalorder %v49_v18, %v470_v4  ;;  %vm83_vm10 = vcmp.lt.s32.totalorder %v46_v21, %v476_v8 }
  0x1c   :  { %vm103_vm2 = vmand %vm69_vm13, %vm87_vm14  ;;  %vm82_vm13 = vcmp.lt.s32.totalorder %v464_v1, %v476_v8 }
  0x1d   :  { %315 = vmatpush.msk.msra.mxu0 %vm108_vm3, %v435_v11  ;;  %331 = vmatpush.msk.msra.mxu1 %vm108_vm3, %v435_v11  ;;  %vm67_vm3 = vcmp.ge.s32.totalorder %v48_v19, %v470_v4  ;;  %vm102_vm5 = vmand %vm68_vm0, %vm86_vm1  ;;  %vm147_vm0 = vcmp.ge.s32.totalorder %v466_v2, %v146_v25  ;;  %vm150_vm1 = vcmp.lt.s32.totalorder %v466_v2, %v149_v26 }
  0x1e   :  { %vm101_vm8 = vmand %vm67_vm3, %vm85_vm4  ;;  %vm215_vm3 = vcmask 1043456   ;;  %vm211_vm4 = vcmask 31744  }
  0x1f   :  { %316 = vmatpush.msk.msra.mxu0 %vm107_vm6, %v435_v11  ;;  %332 = vmatpush.msk.msra.mxu1 %vm107_vm6, %v435_v11  ;;  %vm66_vm6 = vcmp.ge.s32.totalorder %v47_v20, %v470_v4 }
  0x20   :  { %vm100_vm11 = vmand %vm66_vm6, %vm84_vm7 }
  0x21   :  { %317 = vmatpush.msk.msra.mxu0 %vm106_vm9, %v435_v11  ;;  %333 = vmatpush.msk.msra.mxu1 %vm106_vm9, %v435_v11  ;;  %vm65_vm9 = vcmp.ge.s32.totalorder %v46_v21, %v470_v4 }
  0x22   :  { %vm99_vm14 = vmand %vm65_vm9, %vm83_vm10 }
  0x23   :  { %318 = vmatpush.msk.msra.mxu0 %vm105_vm12, %v435_v11  ;;  %334 = vmatpush.msk.msra.mxu1 %vm105_vm12, %v435_v11  ;;  %vm64_vm12 = vcmp.ge.s32.totalorder %v464_v1, %v470_v4 }
  0x25   :  { %319 = vmatpush.msk.msra.mxu0 %vm104_vm15, %v435_v11  ;;  %335 = vmatpush.msk.msra.mxu1 %vm104_vm15, %v435_v11  ;;  %vm98_vm15 = vmand %vm64_vm12, %vm82_vm13 }
  0x27   :  { %320 = vmatpush.msk.msra.mxu0 %vm103_vm2, %v435_v11  ;;  %336 = vmatpush.msk.msra.mxu1 %vm103_vm2, %v435_v11  ;;  %vm151_vm2 = vmand %vm147_vm0, %vm150_vm1 }
  0x28   :  { %v309_v28 = vsel %vm151_vm2, 1.0, %v436_v27 }
  0x29   :  { %321 = vmatpush.msk.msra.mxu0 %vm102_vm5, %v435_v11  ;;  %337 = vmatpush.msk.msra.mxu1 %vm102_vm5, %v435_v11 }
  0x2a   :  { %342 = vmatpush.msk.msra.mxu2 %vm215_vm3, %v309_v28  ;;  %344 = vmatpush.msk.msra.mxu3 %vm215_vm3, %v309_v28 }
  0x2b   :  { %322 = vmatpush.msk.msra.mxu0 %vm101_vm8, %v435_v11  ;;  %338 = vmatpush.msk.msra.mxu1 %vm101_vm8, %v435_v11 }
  0x2d   :  { %323 = vmatpush.msk.msra.mxu0 %vm100_vm11, %v435_v11  ;;  %339 = vmatpush.msk.msra.mxu1 %vm100_vm11, %v435_v11 }
  0x2f   :  { %324 = vmatpush.msk.msra.mxu0 %vm99_vm14, %v435_v11  ;;  %340 = vmatpush.msk.msra.mxu1 %vm99_vm14, %v435_v11 }
  0x31   :  { %325 = vmatpush.msk.msra.mxu0 %vm98_vm15, %v435_v11  ;;  %341 = vmatpush.msk.msra.mxu1 %vm98_vm15, %v435_v11 }
  0x32   :  { %170 = vmatmul.f32.vlgmr.msra.gmra.mxu0 %v43_v22  ;;  %192 = vmatmul.f32.vlgmr.msra.gmra.mxu1 %v175_v23 }
  0xaf   :  { %v171_v29 = vpop.f32.mrf.mxu0  ;;  %v193_v30 = vpop.f32.mrf.mxu1 }
  0xb0   :  { %v174_v31 = vmul.f32 0.03125, %v171_v29  ;;  %v196_v32 = vmul.f32 0.03125, %v193_v30 }
  0xb2   :  { %v197_v33 = vmul.f32 %v174_v31, %v174_v31  ;;  %343 = vmatmul.msk.f32.vlgmr.msra.gmra.mxu2 %vm211_vm4, %v174_v31 }
  0xb4   :  { %v198_v34 = vsub.f32 %v196_v32, %v197_v33 }
  0xb6   :  { %v199_v35 = vmax.f32 %v198_v34, 0.0 }
  0xb8   :  { %v200_v36 = vadd.f32 1e-05, %v199_v35 }
  0xba   :  { %353 = vrsqrt.f32 %v200_v36  ;;  %vm207_vm6 = vweird.f32 %v200_v36 }
  0xc0   :  { %v354_v37 = vpop.eup %353 }
  0xc1   :  { %v202_v38 = vmul.f32 %v354_v37, %v200_v36  ;;  %vm208_vm5 = vweird.f32 %v354_v37 }
  0xc2   :  { %vm209_vm7 = vmor %vm207_vm6, %vm208_vm5 }
  0xc3   :  { %v203_v39 = vmul.f32 %v354_v37, %v202_v38 }
  0xc5   :  { %v204_v40 = vmul.f32 0.5, %v203_v39 }
  0xc7   :  { %v205_v41 = vsub.f32 1.5, %v204_v40 }
  0xc9   :  { %v206_v42 = vmul.f32 %v354_v37, %v205_v41 }
  0xcb   :  { %v210_v43 = vsel %vm209_vm7, %v354_v37, %v206_v42 }
  0xcc   :  { %345 = vmatmul.msk.f32.vlgmr.msra.gmra.mxu3 %vm211_vm4, %v210_v43 }
 0x135   :  { %v236_v44 = vpop.f32.mrf.mxu2 }
 0x136   :  { %v262_v45 = vsub.f32 %v43_v22, %v236_v44 }
 0x14f   :  { %v259_v47 = vpop.f32.mrf.mxu3 }
 0x150   :  { %v263_v48 = vmul.f32 %v262_v45, %v259_v47 }
 0x152   :  { %v268_v50 = vmul.f32 %v351_v46, %v263_v48 }
 0x154   :  { %v273_v51 = vadd.f32 %v352_v49, %v268_v50 }
 0x156   :  { %274 = vst [vmem:[#allocation7] sm:$0xf] %v273_v51 }
 0x157   :  { %285 = dma.vmem_to_hbm [thread:$0]  %s281_s23, 64, %s283_s26, [#allocation4]  }
 0x158   :  { %431 = dma.done.wait [#allocation4], 64  }
 0x159   :  { %432 = vsyncadd [#allocation4], 4294967232 }
 0x15a   :  { %290 = vsyncpa [#allocation3], 1 }
 0x15b   :  { %291 = vsyncpa [#allocation6], 1 }
 0x15c   :  { %292 = vsyncpa [#allocation4], 1 }

</bundles_post_ra>
